<compile_context>
chip_gen: v6e
topology: v6e:2x2x1
jax: 0.10.0
libtpu: 0.0.40
codegen_flags: <defaults>
</compile_context>

<pallas_src>
import math

import jax
import jax.numpy as jnp
from jax.experimental import pallas as pl
from jax.experimental.pallas import tpu as pltpu


_VMEM_LIMIT = 48 * 1024 * 1024            # safe on v7x (64 MiB phys), ample on v5e/v6e
_RESIDENT_SUPPORT_BUDGET = 24 * 1024 * 1024  # total-VMEM gate for the resident bmm path


def _round_up(x: int, m: int) -> int:
    return ((x + m - 1) // m) * m


def _pad_to(arr, target_shape):
    pads = [(0, t - s) for s, t in zip(arr.shape, target_shape)]
    if all(p == (0, 0) for p in pads):
        return arr
    return jnp.pad(arr, pads)


def _pad_dim(d: int, tile: int) -> int:
    """Pad a feature/contraction dim: lane-dense (x128) and tile-divisible."""
    p = _round_up(d, 128)
    if p > tile:
        p = _round_up(p, tile)
    return p


# ---------------------------------------------------------------------------
# Kernel 1: tiled flat GEMM  out = x @ w (+ bias)
# Grid = (M-tiles, N-tiles, K-tiles); f32 accumulator resident across K.
# ---------------------------------------------------------------------------
def _gemm_kernel_bias(x_ref, w_ref, b_ref, o_ref, acc_ref):
    k = pl.program_id(2)

    @pl.when(k == 0)
    def _():
        acc_ref[...] = jnp.zeros_like(acc_ref)

    acc_ref[...] += jnp.dot(
        x_ref[...], w_ref[...], preferred_element_type=jnp.float32
    )

    @pl.when(k == pl.num_programs(2) - 1)
    def _():
        o_ref[...] = (acc_ref[...] + b_ref[...]).astype(o_ref.dtype)


def _gemm_kernel_nobias(x_ref, w_ref, o_ref, acc_ref):
    k = pl.program_id(2)

    @pl.when(k == 0)
    def _():
        acc_ref[...] = jnp.zeros_like(acc_ref)

    acc_ref[...] += jnp.dot(
        x_ref[...], w_ref[...], preferred_element_type=jnp.float32
    )

    @pl.when(k == pl.num_programs(2) - 1)
    def _():
        o_ref[...] = acc_ref[...].astype(o_ref.dtype)


def _gemm(x, w, bias_row, out_dtype, block_m, block_n, block_k):
    """x:(M,K) @ w:(K,N) (+ bias_row:(1,N)) -> (M,N). K,N pre-padded/divisible."""
    M, K = x.shape
    N = w.shape[1]
    TM = min(block_m, _round_up(M, 128))
    Mp = _round_up(M, TM)
    TK = min(block_k, K)
    TN = min(block_n, N)
    assert K % TK == 0 and N % TN == 0
    x = _pad_to(x, (Mp, K))

    in_specs = [
        pl.BlockSpec((TM, TK), lambda i, j, k: (i, k)),
        pl.BlockSpec((TK, TN), lambda i, j, k: (k, j)),
    ]
    operands = [x, w]
    if bias_row is not None:
        in_specs.append(pl.BlockSpec((1, TN), lambda i, j, k: (0, j)))
        operands.append(bias_row)
        kernel = _gemm_kernel_bias
    else:
        kernel = _gemm_kernel_nobias

    out = pl.pallas_call(
        kernel,
        out_shape=jax.ShapeDtypeStruct((Mp, N), out_dtype),
        grid_spec=pltpu.PrefetchScalarGridSpec(
            num_scalar_prefetch=0,
            grid=(Mp // TM, N // TN, K // TK),
            in_specs=in_specs,
            out_specs=pl.BlockSpec((TM, TN), lambda i, j, k: (i, j)),
            scratch_shapes=[pltpu.VMEM((TM, TN), jnp.float32)],
        ),
        compiler_params=pltpu.CompilerParams(
            dimension_semantics=("parallel", "parallel", "arbitrary"),
            vmem_limit_bytes=_VMEM_LIMIT,
        ),
    )(*operands)
    return out[:M]


# ---------------------------------------------------------------------------
# Kernel 2: batched matmul  out[b] = adj[b] @ s[b] (+ bias)
#   Path A (resident): support slab (Sp,N) kept in VMEM per batch, no k loop.
#   Path B (tiled):    grid=(B, q, n, k), f32 accumulator across k.
# ---------------------------------------------------------------------------
def _bmm_resident_kernel_bias(adj_ref, s_ref, b_ref, o_ref):
    acc = jnp.dot(adj_ref[0], s_ref[0], preferred_element_type=jnp.float32)
    o_ref[0] = (acc + b_ref[...]).astype(o_ref.dtype)


def _bmm_resident_kernel_nobias(adj_ref, s_ref, o_ref):
    acc = jnp.dot(adj_ref[0], s_ref[0], preferred_element_type=jnp.float32)
    o_ref[0] = acc.astype(o_ref.dtype)


def _bmm_tiled_kernel_bias(adj_ref, s_ref, b_ref, o_ref, acc_ref):
    k = pl.program_id(3)

    @pl.when(k == 0)
    def _():
        acc_ref[...] = jnp.zeros_like(acc_ref)

    acc_ref[...] += jnp.dot(
        adj_ref[0], s_ref[0], preferred_element_type=jnp.float32
    )

    @pl.when(k == pl.num_programs(3) - 1)
    def _():
        o_ref[0] = (acc_ref[...] + b_ref[...]).astype(o_ref.dtype)


def _bmm_tiled_kernel_nobias(adj_ref, s_ref, o_ref, acc_ref):
    k = pl.program_id(3)

    @pl.when(k == 0)
    def _():
        acc_ref[...] = jnp.zeros_like(acc_ref)

    acc_ref[...] += jnp.dot(
        adj_ref[0], s_ref[0], preferred_element_type=jnp.float32
    )

    @pl.when(k == pl.num_programs(3) - 1)
    def _():
        o_ref[0] = acc_ref[...].astype(o_ref.dtype)


def _bmm(adj, s, bias_row, out_dtype, block_s, block_n, resident_budget):
    B, Sp, _ = adj.shape
    N = s.shape[2]
    TS = min(block_s, Sp)
    assert Sp % TS == 0
    ab = jnp.dtype(adj.dtype).itemsize
    sb = jnp.dtype(s.dtype).itemsize
    ob = jnp.dtype(out_dtype).itemsize

    # --- Path A: per-batch resident support (constant block index across q) ---
    resident_bytes = 2 * TS * Sp * ab + 2 * Sp * N * sb + 2 * TS * N * ob
    if resident_bytes <= resident_budget:
        in_specs = [
            pl.BlockSpec((1, TS, Sp), lambda b, q: (b, q, 0)),
            pl.BlockSpec((1, Sp, N), lambda b, q: (b, 0, 0)),  # DMA'd once per batch
        ]
        operands = [adj, s]
        if bias_row is not None:
            in_specs.append(pl.BlockSpec((1, N), lambda b, q: (0, 0)))
            operands.append(bias_row)
            kernel = _bmm_resident_kernel_bias
        else:
            kernel = _bmm_resident_kernel_nobias
        return pl.pallas_call(
            kernel,
            out_shape=jax.ShapeDtypeStruct((B, Sp, N), out_dtype),
            grid_spec=pltpu.PrefetchScalarGridSpec(
                num_scalar_prefetch=0,
                grid=(B, Sp // TS),
                in_specs=in_specs,
                out_specs=pl.BlockSpec((1, TS, N), lambda b, q: (b, q, 0)),
            ),
            compiler_params=pltpu.CompilerParams(
                dimension_semantics=("parallel", "parallel"),
                vmem_limit_bytes=_VMEM_LIMIT,
            ),
        )(*operands)

    # --- Path B: k-tiled (and N-tiled) with f32 accumulator, k-axis last ---
    TN = min(block_n, N)
    assert N % TN == 0
    in_specs = [
        pl.BlockSpec((1, TS, TS), lambda b, q, n, k: (b, q, k)),
        pl.BlockSpec((1, TS, TN), lambda b, q, n, k: (b, k, n)),
    ]
    operands = [adj, s]
    if bias_row is not None:
        in_specs.append(pl.BlockSpec((1, TN), lambda b, q, n, k: (0, n)))
        operands.append(bias_row)
        kernel = _bmm_tiled_kernel_bias
    else:
        kernel = _bmm_tiled_kernel_nobias
    return pl.pallas_call(
        kernel,
        out_shape=jax.ShapeDtypeStruct((B, Sp, N), out_dtype),
        grid_spec=pltpu.PrefetchScalarGridSpec(
            num_scalar_prefetch=0,
            grid=(B, Sp // TS, N // TN, Sp // TS),
            in_specs=in_specs,
            out_specs=pl.BlockSpec((1, TS, TN), lambda b, q, n, k: (b, q, n)),
            scratch_shapes=[pltpu.VMEM((TS, TN), jnp.float32)],
        ),
        compiler_params=pltpu.CompilerParams(
            dimension_semantics=("parallel", "parallel", "parallel", "arbitrary"),
            vmem_limit_bytes=_VMEM_LIMIT,
        ),
    )(*operands)


# ---------------------------------------------------------------------------
# Public wrapper: GraphConvolution forward.
# ---------------------------------------------------------------------------
def graph_convolution(
    inputs,
    adjacency,
    weight,
    bias=None,
    *,
    compute_dtype=jnp.bfloat16,   # bf16 matmul inputs, f32 accumulation (default)
    block_m=512,                  # M tile for the support GEMM
    block_n=512,                  # N tile (GEMM and tiled bmm)
    block_k=512,                  # K tile for the support GEMM
    block_s=512,                  # adjacency tile edge (all TPU gens)
    resident_support_bytes=_RESIDENT_SUPPORT_BUDGET,
):
    """Pallas GCN forward.

    inputs:    (B, S, F_in)  float32
    adjacency: (B, S, S)     float32
    weight:    (F_in, F_out) float32
    bias:      (F_out,)      float32 or None
    returns:   (B, S, F_out) float32
    """
    B, S, F_in = inputs.shape
    F_out = weight.shape[1]

    # Pad the sequence dim: lane-dense (>=128) and divisible by the adj tile.
    TS = min(block_s, _round_up(S, 128))
    Sp = _round_up(S, TS)
    adj_p = _pad_to(adjacency, (B, Sp, Sp)).astype(compute_dtype)

    bias_f32 = None if bias is None else bias.astype(jnp.float32)

    if F_in <= F_out:
        # out = adj @ (X @ W) + bias  -- the S^2 bmm runs at width Fo_pad.
        Fi_pad = _pad_dim(F_in, block_k)
        Fo_pad = _pad_dim(F_out, block_n)
        x_p = _pad_to(inputs, (B, Sp, Fi_pad)).astype(compute_dtype)
        w_p = _pad_to(weight, (Fi_pad, Fo_pad)).astype(compute_dtype)
        bias_p = (None if bias_f32 is None
                  else _pad_to(bias_f32.reshape(1, F_out), (1, Fo_pad)))

        support = _gemm(
            x_p.reshape(B * Sp, Fi_pad), w_p, None,
            compute_dtype, block_m, block_n, block_k,
        ).reshape(B, Sp, Fo_pad)
        out = _bmm(adj_p, support, bias_p, jnp.float32,
                   block_s, block_n, resident_support_bytes)
        return out[:, :S, :F_out]
    else:
        # out = (adj @ X) @ W + bias  -- the S^2 bmm runs at width Fi_pad.
        Fi_pad = _pad_dim(_pad_dim(F_in, block_n), block_k)
        Fo_pad = _pad_dim(F_out, block_n)
        x_p = _pad_to(inputs, (B, Sp, Fi_pad)).astype(compute_dtype)
        # Keep t = adj@X in f32 and run the final GEMM in f32 so this
        # association does not add a second bf16 rounding step.
        w_p = _pad_to(weight, (Fi_pad, Fo_pad)).astype(jnp.float32)
        bias_p = (None if bias_f32 is None
                  else _pad_to(bias_f32.reshape(1, F_out), (1, Fo_pad)))

        t = _bmm(adj_p, x_p, None, jnp.float32,
                 block_s, block_n, resident_support_bytes)
        out = _gemm(
            t.reshape(B * Sp, Fi_pad), w_p, bias_p,
            jnp.float32, block_m, block_n, block_k,
        ).reshape(B, Sp, Fo_pad)
        return out[:, :S, :F_out]


def init_params(key, in_features, out_features, bias=True):
    """Deterministic init mirroring GraphConvolution.reset_parameters()."""
    stdv = 1.0 / math.sqrt(out_features)
    kw, kb = jax.random.split(key)
    weight = jax.random.uniform(
        kw, (in_features, out_features), jnp.float32, minval=-stdv, maxval=stdv
    )
    b = (
        jax.random.uniform(kb, (out_features,), jnp.float32, minval=-stdv, maxval=stdv)
        if bias
        else None
    )
    return weight, b


if __name__ == "__main__":
    key = jax.random.PRNGKey(0)
    k_x, k_adj, k_param = jax.random.split(key, 3)

    def reference(x, adj, w, b):
        B, S, F_in = x.shape
        sup = (x.reshape(B * S, F_in) @ w).reshape(B, S, w.shape[1])
        out = jnp.einsum("bij,bjf->bif", adj, sup)
        return out if b is None else out + b

    # Small shapes implied by the module: batch=2, seq=8, hidden 32 -> 32.
    B, S, F_in, F_out = 2, 8, 32, 32
    x = jax.random.normal(k_x, (B, S, F_in), jnp.float32)
    adj = jax.random.uniform(k_adj, (B, S, S), jnp.float32)
    w, b = init_params(k_param, F_in, F_out, bias=True)
    ref = reference(x, adj, w, b)

    # Default path: bf16 matmul inputs, f32 accumulation, resident support bmm.
    out = jax.block_until_ready(graph_convolution(x, adj, w, b))
    assert out.shape == (B, S, F_out)
    assert jnp.allclose(out, ref, atol=5e-2, rtol=5e-2), "bf16 mismatch vs reference"

    # Explicit f32 compute path, tight tolerance.
    out32 = jax.block_until_ready(
        graph_convolution(x, adj, w, b, compute_dtype=jnp.float32)
    )
    assert jnp.allclose(out32, ref, atol=1e-4, rtol=1e-4), "f32 mismatch vs reference"

    # Force the k/n-tiled bmm path (resident budget 0); also exercises no-bias.
    ref_nb = reference(x, adj, w, None)
    out_tiled = jax.block_until_ready(
        graph_convolution(x, adj, w, None, compute_dtype=jnp.float32,
                          resident_support_bytes=0)
    )
    assert jnp.allclose(out_tiled, ref_nb, atol=1e-4, rtol=1e-4), "tiled-bmm mismatch"

    # (adj @ X) @ W association (F_in > F_out) with a multi-K-tile GEMM.
    F_in2, F_out2 = 640, 64
    w2, b2 = init_params(k_param, F_in2, F_out2, bias=True)
    x2 = jax.random.normal(k_x, (B, S, F_in2), jnp.float32)
    ref2 = reference(x2, adj, w2, b2)
    out2 = jax.block_until_ready(
        graph_convolution(x2, adj, w2, b2, compute_dtype=jnp.float32)
    )
    assert out2.shape == (B, S, F_out2)
    assert jnp.allclose(out2, ref2, atol=1e-3, rtol=1e-3), "assoc-swap mismatch"

    print("KERNEL_OK")
</pallas_src>

<mosaic_0001>
module attributes {stable_mosaic.version = 11 : i64} {
  func.func @_gemm_kernel_nobias(%arg0: i32, %arg1: i32, %arg2: i32, %arg3: memref<256x128xbf16, #tpu.memory_space<vmem>>, %arg4: memref<128x128xbf16, #tpu.memory_space<vmem>>, %arg5: memref<256x128xbf16, #tpu.memory_space<vmem>>, %arg6: memref<256x128xf32, #tpu.memory_space<vmem>>) attributes {dimension_semantics = [#tpu.dimension_semantics<parallel>, #tpu.dimension_semantics<parallel>, #tpu.dimension_semantics<arbitrary>], iteration_bounds = array<i64: 1, 1, 1>, scalar_prefetch = 0 : i64, scratch_operands = 1 : i64, tpu.core_type = #tpu.core_type<tc>, window_params = [{transform_indices = @transform_0, window_bounds = array<i64: 256, 128>}, {transform_indices = @transform_1, window_bounds = array<i64: 128, 128>}, {transform_indices = @transform_2, window_bounds = array<i64: 256, 128>}]} {
    %c0_i32 = arith.constant 0 : i32
    %0 = arith.cmpi eq, %arg2, %c0_i32 : i32
    %1 = arith.extui %0 : i1 to i32
    %c0_i32_0 = arith.constant 0 : i32
    %2 = arith.cmpi ne, %1, %c0_i32_0 : i32
    scf.if %2 {
      %cst_10 = arith.constant 0.000000e+00 : f32
      %12 = vector.broadcast %cst_10 : f32 to vector<256x128xf32>
      %c0_11 = arith.constant 0 : index
      %c0_12 = arith.constant 0 : index
      %13 = vector.load %arg6[%c0_11, %c0_12] : memref<256x128xf32, #tpu.memory_space<vmem>>, vector<256x128xf32>
      tpu.vector_store %arg6[%c0_11, %c0_12], %12 {strides = array<i32>} : memref<256x128xf32, #tpu.memory_space<vmem>>, vector<256x128xf32>,
    } else {
    }
    %c0 = arith.constant 0 : index
    %c0_1 = arith.constant 0 : index
    %3 = vector.load %arg6[%c0, %c0_1] : memref<256x128xf32, #tpu.memory_space<vmem>>, vector<256x128xf32>
    %c0_2 = arith.constant 0 : index
    %c0_3 = arith.constant 0 : index
    %4 = vector.load %arg3[%c0_2, %c0_3] : memref<256x128xbf16, #tpu.memory_space<vmem>>, vector<256x128xbf16>
    %c0_4 = arith.constant 0 : index
    %c0_5 = arith.constant 0 : index
    %5 = vector.load %arg4[%c0_4, %c0_5] : memref<128x128xbf16, #tpu.memory_space<vmem>>, vector<128x128xbf16>
    %cst = arith.constant dense<0.000000e+00> : vector<256x128xf32>
    %6 = tpu.matmul %4, %5, %cst {dimension_numbers = #tpu.dot_dimension_numbers<[1], [0], [0], [1], [0, 0, 1, 1], [], []>} : vector<256x128xbf16>, vector<128x128xbf16>, vector<256x128xf32> -> vector<256x128xf32>
    %7 = arith.addf %3, %6 : vector<256x128xf32>
    %c0_6 = arith.constant 0 : index
    %c0_7 = arith.constant 0 : index
    %8 = vector.load %arg6[%c0_6, %c0_7] : memref<256x128xf32, #tpu.memory_space<vmem>>, vector<256x128xf32>
    tpu.vector_store %arg6[%c0_6, %c0_7], %7 {strides = array<i32>} : memref<256x128xf32, #tpu.memory_space<vmem>>, vector<256x128xf32>,
    %c0_i32_8 = arith.constant 0 : i32
    %9 = arith.cmpi eq, %arg2, %c0_i32_8 : i32
    %10 = arith.extui %9 : i1 to i32
    %c0_i32_9 = arith.constant 0 : i32
    %11 = arith.cmpi ne, %10, %c0_i32_9 : i32
    scf.if %11 {
      %c0_10 = arith.constant 0 : index
      %c0_11 = arith.constant 0 : index
      %12 = vector.load %arg6[%c0_10, %c0_11] : memref<256x128xf32, #tpu.memory_space<vmem>>, vector<256x128xf32>
      %13 = arith.truncf %12 : vector<256x128xf32> to vector<256x128xbf16>
      %c0_12 = arith.constant 0 : index
      %c0_13 = arith.constant 0 : index
      %14 = vector.load %arg5[%c0_12, %c0_13] : memref<256x128xbf16, #tpu.memory_space<vmem>>, vector<256x128xbf16>
      tpu.vector_store %arg5[%c0_12, %c0_13], %13 {strides = array<i32>} : memref<256x128xbf16, #tpu.memory_space<vmem>>, vector<256x128xbf16>,
    } else {
    }
    return
  }
  func.func @transform_0(%arg0: i32, %arg1: i32, %arg2: i32) -> (i32, i32) {
    %c0_i32 = arith.constant 0 : i32
    return %arg0, %arg2 : i32, i32
  }
  func.func @transform_1(%arg0: i32, %arg1: i32, %arg2: i32) -> (i32, i32) {
    %c0_i32 = arith.constant 0 : i32
    return %arg2, %arg1 : i32, i32
  }
  func.func @transform_2(%arg0: i32, %arg1: i32, %arg2: i32) -> (i32, i32) {
    %c0_i32 = arith.constant 0 : i32
    return %arg0, %arg1 : i32, i32
  }
}

</mosaic_0001>

<bundles_post_ra>
// kernel: tpu_custom_call.1
= control target key start
LH: loop header
LB: loop body
LE: loop exit
PB: predicated region body
PF: predicated region fallthrough
CT: control target
= control target key end

     0   :  { %7 = vsyncpa [#allocation4], 0  ;;  %s1143_s0 = inlined_call_operand.hbm [shape: bf16[256,128], index: 0, kind: input, shape index: {}]   ;;  %s1144_s1 = inlined_call_operand.hbm [shape: bf16[128,128], index: 1, kind: input, shape index: {}]   ;;  %s1145_s2 = inlined_call_operand.hbm [shape: bf16[256,128], index: 2, kind: output, shape index: {}]  }
   0x1   :  { %8 = vsyncpa [#allocation7], 0 }
   0x2   :  { %9 = vsyncpa [#allocation5], 0  ;;  %s1105_s9 = smov [#allocation3]  }
   0x3   :  { %s15_s10 = sshll.u32 %s1105_s9, 4  ;;  %s16_s10 = int_to_ptr.vmem [resolvable:$true] %s15_s10 }
   0x4   :  { %s1047_s11 = scalar_lea.vmem %s16_s10, 2048  ;;  %p1052_p1 = scmp.lt.s32.totalorder %s16_s10, %s16_s10 }
   0x5   :  { %p1048_p0 = scmp.ne.s32.totalorder %s16_s10, %s1047_s11  ;;  %p1053_p2 = scmp.lt.s32.totalorder %s1047_s11, %s1047_s11 }
   0x7   :  { %p1054_p3 = por %p1053_p2, %p1052_p1 }
   0x9   :  { %p1055_p4 = pnand %p1054_p3, %p1048_p0 }
   0xb   :  { %1058 = shalt.err (!%p1055_p4)
}
   0xc   :  { %s1106_s12 = smov 64   ;;  %s1107_s13 = smov 4  }
   0xd   :  { %21 = dma.hbm_to_vmem [thread:$0]  %s1143_s0, 2048, %s16_s10, [#allocation4], %s1106_s12, %s1106_s12, %s1107_s13  }
   0xe   :  { %s1108_s16 = smov [#allocation6]  }
   0xf   :  { %s27_s17 = sshll.u32 %s1108_s16, 4  ;;  %s28_s17 = int_to_ptr.vmem [resolvable:$true] %s27_s17 }
  0x10   :  { %s1067_s18 = scalar_lea.vmem %s28_s17, 1024  ;;  %p1072_p6 = scmp.lt.s32.totalorder %s28_s17, %s28_s17 }
  0x11   :  { %p1068_p5 = scmp.ne.s32.totalorder %s28_s17, %s1067_s18  ;;  %p1073_p7 = scmp.lt.s32.totalorder %s1067_s18, %s1067_s18 }
  0x13   :  { %p1074_p8 = por %p1073_p7, %p1072_p6 }
  0x15   :  { %p1075_p9 = pnand %p1074_p8, %p1068_p5 }
  0x17   :  { %1078 = shalt.err (!%p1075_p9)
}
  0x18   :  { %33 = dma.hbm_to_vmem [thread:$0]  %s1144_s1, 1024, %s28_s17, [#allocation7], %s1106_s12, %s1106_s12, %s1107_s13  }
  0x19   :  { %1099 = dma.done.wait [#allocation4], 2048  }
  0x1a   :  { %1100 = vsyncadd [#allocation4], 4294965248 }
  0x1b   :  { %1101 = dma.done.wait [#allocation7], 1024  }
  0x1c   :  { %1102 = vsyncadd [#allocation7], 4294966272  ;;  %v1015_v0 = vld [vmem:[#allocation6 + $0x38] sm:$0xff]   ;;  %v1016_v1 = vld [vmem:[#allocation6 + $0x30] sm:$0xff]   ;;  %s1109_s0 = smov [#allocation8]  }
  0x1d   :  { %946 = vmatprep.subr.bf16.mxu0 %v1015_v0  ;;  %994 = vmatprep.subr.bf16.mxu1 %v1015_v0  ;;  %v1017_v2 = vld [vmem:[#allocation6 + $0x28] sm:$0xff]   ;;  %v1018_v3 = vld [vmem:[#allocation6 + $0x20] sm:$0xff]   ;;  %v1019_v6 = vld [vmem:[#allocation6 + $0x18] sm:$0xff]   ;;  %s726_s1 = sshll.u32 %s1109_s0, 4  ;;  %s727_s1 = int_to_ptr.vmem [resolvable:$true] %s726_s1 }
  0x1e   :  { %947 = vmatpush3.bf16.msra.mxu0 %v1015_v0  ;;  %1002 = vmatpush3.bf16.msra.mxu1 %v1015_v0  ;;  %v1023_v4 = vld [vmem:[#allocation3] sm:$0xff]   ;;  %v1020_v7 = vld [vmem:[#allocation6 + $0x10] sm:$0xff]   ;;  %v1021_v8 = vld [vmem:[#allocation6 + $0x8] sm:$0xff]   ;;  %s1079_s21 = scalar_lea.vmem %s727_s1, 2048  ;;  %p1084_p11 = scmp.lt.s32.totalorder %s727_s1, %s727_s1 }
  0x1f   :  { %948 = vmatprep.subr.bf16.mxu0 %v1016_v1  ;;  %995 = vmatprep.subr.bf16.mxu1 %v1016_v1  ;;  %v1024_v5 = vld [vmem:[#allocation3 + $0x40] sm:$0xff]   ;;  %v1025_v10 = vld [vmem:[#allocation3 + $0x8] sm:$0xff]   ;;  %v1027_v12 = vld [vmem:[#allocation3 + $0x10] sm:$0xff]   ;;  %p1080_p10 = scmp.ne.s32.totalorder %s727_s1, %s1079_s21  ;;  %p1085_p12 = scmp.lt.s32.totalorder %s1079_s21, %s1079_s21 }
  0x20   :  { %962 = vmatprep.mubr.bf16.mxu0 %v1023_v4  ;;  %978 = vmatprep.mubr.bf16.mxu1 %v1024_v5  ;;  %v1022_v9 = vld [vmem:[#allocation6] sm:$0xff]   ;;  %v1026_v11 = vld [vmem:[#allocation3 + $0x48] sm:$0xff]   ;;  %v1028_v13 = vld [vmem:[#allocation3 + $0x50] sm:$0xff]  }
  0x21   :  { %v1029_v14 = vld [vmem:[#allocation3 + $0x18] sm:$0xff]   ;;  %v1031_v16 = vld [vmem:[#allocation3 + $0x20] sm:$0xff]   ;;  %v1033_v18 = vld [vmem:[#allocation3 + $0x28] sm:$0xff]   ;;  %p1086_p13 = por %p1085_p12, %p1084_p11 }
  0x22   :  { %949 = vmatpush3.bf16.msra.mxu0 %v1016_v1  ;;  %1003 = vmatpush3.bf16.msra.mxu1 %v1016_v1  ;;  %v1030_v15 = vld [vmem:[#allocation3 + $0x58] sm:$0xff]   ;;  %v1032_v17 = vld [vmem:[#allocation3 + $0x60] sm:$0xff]   ;;  %v1034_v19 = vld [vmem:[#allocation3 + $0x68] sm:$0xff]  }
  0x23   :  { %950 = vmatprep.subr.bf16.mxu0 %v1017_v2  ;;  %996 = vmatprep.subr.bf16.mxu1 %v1017_v2  ;;  %v1035_v20 = vld [vmem:[#allocation3 + $0x30] sm:$0xff]   ;;  %v1037_v22 = vld [vmem:[#allocation3 + $0x38] sm:$0xff]   ;;  %p1087_p0 = pnand %p1086_p13, %p1080_p10 }
  0x24   :  { %v1036_v21 = vld [vmem:[#allocation3 + $0x70] sm:$0xff]   ;;  %v1038_v23 = vld [vmem:[#allocation3 + $0x78] sm:$0xff]  }
  0x26   :  { %951 = vmatpush3.bf16.msra.mxu0 %v1017_v2  ;;  %1004 = vmatpush3.bf16.msra.mxu1 %v1017_v2 }
  0x27   :  { %952 = vmatprep.subr.bf16.mxu0 %v1018_v3  ;;  %997 = vmatprep.subr.bf16.mxu1 %v1018_v3 }
  0x2a   :  { %953 = vmatpush3.bf16.msra.mxu0 %v1018_v3  ;;  %1005 = vmatpush3.bf16.msra.mxu1 %v1018_v3 }
  0x2b   :  { %954 = vmatprep.subr.bf16.mxu0 %v1019_v6  ;;  %998 = vmatprep.subr.bf16.mxu1 %v1019_v6 }
  0x2e   :  { %955 = vmatpush3.bf16.msra.mxu0 %v1019_v6  ;;  %1006 = vmatpush3.bf16.msra.mxu1 %v1019_v6 }
  0x2f   :  { %956 = vmatprep.subr.bf16.mxu0 %v1020_v7  ;;  %999 = vmatprep.subr.bf16.mxu1 %v1020_v7 }
  0x32   :  { %957 = vmatpush3.bf16.msra.mxu0 %v1020_v7  ;;  %1007 = vmatpush3.bf16.msra.mxu1 %v1020_v7 }
  0x33   :  { %958 = vmatprep.subr.bf16.mxu0 %v1021_v8  ;;  %1000 = vmatprep.subr.bf16.mxu1 %v1021_v8 }
  0x36   :  { %959 = vmatpush3.bf16.msra.mxu0 %v1021_v8  ;;  %1008 = vmatpush3.bf16.msra.mxu1 %v1021_v8 }
  0x37   :  { %960 = vmatprep.subr.bf16.mxu0 %v1022_v9  ;;  %1001 = vmatprep.subr.bf16.mxu1 %v1022_v9 }
  0x3a   :  { %961 = vmatpush3.bf16.msra.mxu0 %v1022_v9  ;;  %1009 = vmatpush3.bf16.msra.mxu1 %v1022_v9 }
  0x3d   :  { %963 = vmatmul.mubr.bf16.vlgmr.msra.gmra.mxu0 %v1025_v10  ;;  %979 = vmatmul.mubr.bf16.vlgmr.msra.gmra.mxu1 %v1026_v11 }
  0x3e   :  { %966 = vmatprep.mubr.bf16.mxu0 %v1027_v12  ;;  %982 = vmatprep.mubr.bf16.mxu1 %v1028_v13 }
  0x45   :  { %967 = vmatmul.mubr.bf16.gmra.mxu0 %v1029_v14  ;;  %983 = vmatmul.mubr.bf16.gmra.mxu1 %v1030_v15 }
  0x46   :  { %970 = vmatprep.mubr.bf16.mxu0 %v1031_v16  ;;  %986 = vmatprep.mubr.bf16.mxu1 %v1032_v17 }
  0x4d   :  { %971 = vmatmul.mubr.bf16.gmra.mxu0 %v1033_v18  ;;  %987 = vmatmul.mubr.bf16.gmra.mxu1 %v1034_v19 }
  0x4e   :  { %974 = vmatprep.mubr.bf16.mxu0 %v1035_v20  ;;  %990 = vmatprep.mubr.bf16.mxu1 %v1036_v21 }
  0x55   :  { %975 = vmatmul.mubr.bf16.gmra.mxu0 %v1037_v22  ;;  %991 = vmatmul.mubr.bf16.gmra.mxu1 %v1038_v23 }
  0xfd   :  { %v964_v24 = vpop.f32.mrf.mxu0  ;;  %v980_v25 = vpop.f32.mrf.mxu1 }
  0xff   :  { %v335_v26 = vpop.f32.mrf.mxu0  ;;  %v399_v27 = vpop.f32.mrf.mxu1 }
 0x101   :  { %v965_v28 = vpop.f32.mrf.mxu0  ;;  %v981_v29 = vpop.f32.mrf.mxu1 }
 0x102   :  { %v835_v30 = vpack.c.bf16 %v965_v28, %v964_v24  ;;  %v875_v31 = vpack.c.bf16 %v981_v29, %v980_v25 }
 0x103   :  { %v338_v32 = vpop.f32.mrf.mxu0  ;;  %v402_v33 = vpop.f32.mrf.mxu1 }
 0x104   :  { %907 = vst [vmem:[#allocation8 + $0x8] sm:$0xff] %v835_v30   ;;  %915 = vst [vmem:[#allocation8 + $0x48] sm:$0xff] %v875_v31   ;;  %v830_v34 = vpack.c.bf16 %v338_v32, %v335_v26  ;;  %v870_v35 = vpack.c.bf16 %v402_v33, %v399_v27 }
 0x105   :  { %v968_v36 = vpop.f32.mrf.mxu0  ;;  %v984_v37 = vpop.f32.mrf.mxu1 }
 0x106   :  { %831 = vst [vmem:[#allocation8] sm:$0xff] %v830_v34   ;;  %914 = vst [vmem:[#allocation8 + $0x40] sm:$0xff] %v870_v35  }
 0x107   :  { %v351_v38 = vpop.f32.mrf.mxu0  ;;  %v415_v39 = vpop.f32.mrf.mxu1 }
 0x109   :  { %v969_v40 = vpop.f32.mrf.mxu0  ;;  %v985_v41 = vpop.f32.mrf.mxu1 }
 0x10a   :  { %v845_v42 = vpack.c.bf16 %v969_v40, %v968_v36  ;;  %v885_v43 = vpack.c.bf16 %v985_v41, %v984_v37 }
 0x10b   :  { %v354_v44 = vpop.f32.mrf.mxu0  ;;  %v418_v45 = vpop.f32.mrf.mxu1 }
 0x10c   :  { %909 = vst [vmem:[#allocation8 + $0x18] sm:$0xff] %v845_v42   ;;  %917 = vst [vmem:[#allocation8 + $0x58] sm:$0xff] %v885_v43   ;;  %v840_v46 = vpack.c.bf16 %v354_v44, %v351_v38  ;;  %v880_v47 = vpack.c.bf16 %v418_v45, %v415_v39 }
 0x10d   :  { %v972_v48 = vpop.f32.mrf.mxu0  ;;  %v988_v49 = vpop.f32.mrf.mxu1 }
 0x10e   :  { %908 = vst [vmem:[#allocation8 + $0x10] sm:$0xff] %v840_v46   ;;  %916 = vst [vmem:[#allocation8 + $0x50] sm:$0xff] %v880_v47  }
 0x10f   :  { %v367_v50 = vpop.f32.mrf.mxu0  ;;  %v431_v51 = vpop.f32.mrf.mxu1 }
 0x111   :  { %v973_v52 = vpop.f32.mrf.mxu0  ;;  %v989_v53 = vpop.f32.mrf.mxu1 }
 0x112   :  { %v855_v54 = vpack.c.bf16 %v973_v52, %v972_v48  ;;  %v895_v55 = vpack.c.bf16 %v989_v53, %v988_v49 }
 0x113   :  { %v370_v56 = vpop.f32.mrf.mxu0  ;;  %v434_v57 = vpop.f32.mrf.mxu1 }
 0x114   :  { %911 = vst [vmem:[#allocation8 + $0x28] sm:$0xff] %v855_v54   ;;  %919 = vst [vmem:[#allocation8 + $0x68] sm:$0xff] %v895_v55   ;;  %v850_v58 = vpack.c.bf16 %v370_v56, %v367_v50  ;;  %v890_v59 = vpack.c.bf16 %v434_v57, %v431_v51 }
 0x115   :  { %v976_v60 = vpop.f32.mrf.mxu0  ;;  %v992_v61 = vpop.f32.mrf.mxu1 }
 0x116   :  { %910 = vst [vmem:[#allocation8 + $0x20] sm:$0xff] %v850_v58   ;;  %918 = vst [vmem:[#allocation8 + $0x60] sm:$0xff] %v890_v59  }
 0x117   :  { %v383_v62 = vpop.f32.mrf.mxu0  ;;  %v447_v63 = vpop.f32.mrf.mxu1 }
 0x119   :  { %v977_v0 = vpop.f32.mrf.mxu0  ;;  %v993_v1 = vpop.f32.mrf.mxu1 }
 0x11a   :  { %v865_v2 = vpack.c.bf16 %v977_v0, %v976_v60  ;;  %v905_v3 = vpack.c.bf16 %v993_v1, %v992_v61 }
 0x11b   :  { %v386_v4 = vpop.f32.mrf.mxu0  ;;  %v450_v5 = vpop.f32.mrf.mxu1 }
 0x11c   :  { %913 = vst [vmem:[#allocation8 + $0x38] sm:$0xff] %v865_v2   ;;  %921 = vst [vmem:[#allocation8 + $0x78] sm:$0xff] %v905_v3   ;;  %v860_v6 = vpack.c.bf16 %v386_v4, %v383_v62  ;;  %v900_v7 = vpack.c.bf16 %v450_v5, %v447_v63 }
 0x11e   :  { %912 = vst [vmem:[#allocation8 + $0x30] sm:$0xff] %v860_v6   ;;  %920 = vst [vmem:[#allocation8 + $0x70] sm:$0xff] %v900_v7  }
 0x11f   :  { %1090 = shalt.err (!%p1087_p0)
}
 0x120   :  { %732 = dma.vmem_to_hbm [thread:$0]  %s727_s1, 2048, %s1145_s2, [#allocation5], %s1106_s12, %s1106_s12, %s1107_s13  }
 0x121   :  { %1103 = dma.done.wait [#allocation5], 2048  }
 0x122   :  { %1104 = vsyncadd [#allocation5], 4294965248 }
 0x123   :  { %736 = vsyncpa [#allocation4], 1 }
 0x124   :  { %737 = vsyncpa [#allocation7], 1 }
 0x125   :  { %738 = vsyncpa [#allocation5], 1 }

</bundles_post_ra>
